<compile_context>
chip_gen: v6e
topology: v6e:2x2x1
jax: 0.10.0
libtpu: 0.0.40
codegen_flags: <defaults>
</compile_context>

<pallas_src>
import jax
import jax.numpy as jnp
import numpy as np
from jax import lax
from jax.experimental import pallas as pl
from jax.experimental.pallas import tpu as pltpu


def _round_up(v, m):
    return (v + m - 1) // m * m


def _make_kernel(W, L1, L2, Fd, Cin_p, Cm_p, CC, PD):
    """Builds the per-image kernel closure over the static geometry constants."""
    cc_pad = CC - L2          # = W - W2 (trimmed flat-layout wrap columns)
    pd_pad = PD - Fd

    def kernel(x_ref, w1_ref, b1_ref, w2_ref, b2_ref,
               cc_ref, pd_ref, h1_ref, s1_ref, s2_ref):
        # x_ref : (Cin_p, H*W)      one image, channels-first, spatial flattened on lanes
        # w1_ref: (Cm_p, 9*Cin_p)   im2col weight slab (tap-major, channel-minor)
        # w2_ref: (Cm_p, 9*Cm_p)
        # b*_ref: (Cm_p, 1)
        # cc_ref: (Cm_p, H2*W)      flat padded conv-block output (row width W)
        # pd_ref: (Cm_p, (H2-1)*W)  dense 2x2-window max map (valid at anchors 2i*W+2j)
        # h1_ref: (Cm_p, L1) f32    conv1 activations (flat layout, scratch)
        # s1_ref: (9*Cin_p, L1)     conv1 im2col slab (scratch)
        # s2_ref: (9*Cm_p, L2)      conv2 im2col slab (scratch)

        b1 = b1_ref[...]            # (Cm_p, 1), lane-broadcast once
        b2 = b2_ref[...]

        # ---- conv1 (3x3 valid) + ReLU: build slab, one MXU matmul ----
        for t in range(9):
            ky, kx = divmod(t, 3)
            s1_ref[pl.ds(t * Cin_p, Cin_p), :] = x_ref[:, pl.ds(ky * W + kx, L1)]
        acc1 = jnp.dot(w1_ref[...], s1_ref[...], preferred_element_type=jnp.float32)
        h1_ref[...] = jnp.maximum(acc1 + b1, 0.0)

        # ---- conv2 (3x3 valid) + ReLU ----
        for t in range(9):
            ky, kx = divmod(t, 3)
            s2_ref[pl.ds(t * Cm_p, Cm_p), :] = h1_ref[:, pl.ds(ky * W + kx, L2)]
        acc2 = jnp.dot(w2_ref[...], s2_ref[...], preferred_element_type=jnp.float32)
        h2 = jnp.maximum(acc2 + b2, 0.0)                      # (Cm_p, L2)

        # ---- cc: one lane-dense store (+ tiny zero tail so trimmed lanes are defined) ----
        cc_ref[:, pl.ds(0, L2)] = h2.astype(cc_ref.dtype)
        cc_ref[:, pl.ds(L2, cc_pad)] = jnp.zeros((Cm_p, cc_pad), cc_ref.dtype)

        # ---- maxpool 2x2/s2: dense window max from four contiguous tap reads ----
        t00 = cc_ref[:, pl.ds(0, Fd)]
        t01 = cc_ref[:, pl.ds(1, Fd)]
        t10 = cc_ref[:, pl.ds(W, Fd)]
        t11 = cc_ref[:, pl.ds(W + 1, Fd)]
        pd_ref[:, pl.ds(0, Fd)] = jnp.maximum(jnp.maximum(t00, t01),
                                              jnp.maximum(t10, t11))
        pd_ref[:, pl.ds(Fd, pd_pad)] = jnp.zeros((Cm_p, pd_pad), pd_ref.dtype)

    return kernel


def contracting_block(x_nchw, w1_oihw, b1, w2_oihw, b2):
    """Forward pass of ContractingBlock. Returns (cc_out, pool) in NCHW like PyTorch."""
    N, Cin, H, W = x_nchw.shape
    Cm = w1_oihw.shape[0]
    H1, W1 = H - 2, W - 2
    H2, W2 = H - 4, W - 4
    Hp, Wp = H2 // 2, W2 // 2

    Cin_p = _round_up(Cin, 8)         # channel padding -> aligned im2col slab stores
    Cm_p = _round_up(Cm, 8)
    HW = H * W
    L1 = (H1 - 1) * W + W1            # flat span covering every valid conv1 output
    L2 = (H2 - 1) * W + W2            # flat span covering every valid conv2 output
    Fd = L2 - W - 1                   # dense pool anchors computed: f in [0, Fd)
    CC = H2 * W                       # flat padded cc lane width
    PD = (H2 - 1) * W                 # flat padded dense-pool lane width

    # Boundary glue (layout only): NCHW is already channels-first; flatten spatial (free
    # reshape) and zero-pad channels to a multiple of 8.
    x = x_nchw.reshape(N, Cin, HW)
    if Cin_p != Cin:
        x = jnp.pad(x, ((0, 0), (0, Cin_p - Cin), (0, 0)))

    # Weight slabs: [o, (ky*3+kx)*C_p + ci] = w[o, ci, ky, kx]; padded rows/cols are zero.
    w1s = jnp.transpose(w1_oihw, (0, 2, 3, 1))                       # (Cm,3,3,Cin)
    w1s = jnp.pad(w1s, ((0, Cm_p - Cm), (0, 0), (0, 0), (0, Cin_p - Cin)))
    w1s = w1s.reshape(Cm_p, 9 * Cin_p)
    w2s = jnp.transpose(w2_oihw, (0, 2, 3, 1))                       # (Cm,3,3,Cm)
    w2s = jnp.pad(w2s, ((0, Cm_p - Cm), (0, 0), (0, 0), (0, Cm_p - Cm)))
    w2s = w2s.reshape(Cm_p, 9 * Cm_p)
    b1p = jnp.pad(b1, (0, Cm_p - Cm)).reshape(Cm_p, 1)
    b2p = jnp.pad(b2, (0, Cm_p - Cm)).reshape(Cm_p, 1)

    kernel = _make_kernel(W, L1, L2, Fd, Cin_p, Cm_p, CC, PD)

    grid_spec = pltpu.PrefetchScalarGridSpec(
        num_scalar_prefetch=0,
        grid=(N,),
        in_specs=[
            pl.BlockSpec((None, Cin_p, HW), lambda n: (n, 0, 0)),
            pl.BlockSpec((Cm_p, 9 * Cin_p), lambda n: (0, 0)),
            pl.BlockSpec((Cm_p, 1), lambda n: (0, 0)),
            pl.BlockSpec((Cm_p, 9 * Cm_p), lambda n: (0, 0)),
            pl.BlockSpec((Cm_p, 1), lambda n: (0, 0)),
        ],
        out_specs=[
            pl.BlockSpec((None, Cm_p, CC), lambda n: (n, 0, 0)),
            pl.BlockSpec((None, Cm_p, PD), lambda n: (n, 0, 0)),
        ],
        scratch_shapes=[
            pltpu.VMEM((Cm_p, L1), jnp.float32),          # conv1 activations
            pltpu.VMEM((9 * Cin_p, L1), x.dtype),          # conv1 im2col slab
            pltpu.VMEM((9 * Cm_p, L2), jnp.float32),       # conv2 im2col slab
        ],
    )

    ccflat, pdense = pl.pallas_call(
        kernel,
        out_shape=(
            jax.ShapeDtypeStruct((N, Cm_p, CC), x_nchw.dtype),
            jax.ShapeDtypeStruct((N, Cm_p, PD), x_nchw.dtype),
        ),
        grid_spec=grid_spec,
        # Batch elements are independent -> shard the grid across v7x's two TensorCores.
        compiler_params=pltpu.CompilerParams(dimension_semantics=("parallel",)),
    )(x, w1s, b1p, w2s, b2p)

    # Boundary glue (indexing only): free reshape + trim of the flat-layout wrap columns,
    # and the stride-2 anchor selection of the in-kernel dense 2x2 window maxima.
    cc = ccflat.reshape(N, Cm_p, H2, W)[:, :Cm, :, :W2]
    pool = pdense.reshape(N, Cm_p, H2 - 1, W)[:, :Cm, 0:2 * Hp:2, 0:2 * Wp:2]
    return cc, pool


if __name__ == "__main__":
    key = jax.random.PRNGKey(0)
    N, Cin, Cout, H, W = 2, 4, 8, 16, 16
    k1, k2, k3, k4, k5 = jax.random.split(key, 5)

    x = jax.random.normal(k1, (N, Cin, H, W), jnp.float32)

    # Deterministic init with PyTorch parameter shapes (Conv2d: OIHW weight + bias).
    bound1 = 1.0 / np.sqrt(Cin * 9)
    w1 = jax.random.uniform(k2, (Cout, Cin, 3, 3), jnp.float32, -bound1, bound1)
    b1 = jax.random.uniform(k3, (Cout,), jnp.float32, -bound1, bound1)
    bound2 = 1.0 / np.sqrt(Cout * 9)
    w2 = jax.random.uniform(k4, (Cout, Cout, 3, 3), jnp.float32, -bound2, bound2)
    b2 = jax.random.uniform(k5, (Cout,), jnp.float32, -bound2, bound2)

    cc, pool = jax.jit(contracting_block)(x, w1, b1, w2, b2)
    jax.block_until_ready((cc, pool))

    # Plain-JAX reference (same semantics as the PyTorch module) for a sanity check.
    def ref_forward(xr, w1r, b1r, w2r, b2r):
        def conv_relu(h, w, b):
            y = lax.conv_general_dilated(h, w, (1, 1), 'VALID',
                                         dimension_numbers=('NCHW', 'OIHW', 'NCHW'))
            return jnp.maximum(y + b[None, :, None, None], 0.0)
        h = conv_relu(xr, w1r, b1r)
        cc_r = conv_relu(h, w2r, b2r)
        pool_r = lax.reduce_window(cc_r, -jnp.inf, lax.max,
                                   (1, 1, 2, 2), (1, 1, 2, 2), 'VALID')
        return cc_r, pool_r

    cc_ref, pool_ref = ref_forward(x, w1, b1, w2, b2)
    assert cc.shape == (N, Cout, H - 4, W - 4)
    assert pool.shape == (N, Cout, (H - 4) // 2, (W - 4) // 2)
    np.testing.assert_allclose(np.asarray(cc), np.asarray(cc_ref), rtol=1e-4, atol=1e-4)
    np.testing.assert_allclose(np.asarray(pool), np.asarray(pool_ref), rtol=1e-4, atol=1e-4)

    print("KERNEL_OK")
</pallas_src>

<mosaic_0001>
module attributes {stable_mosaic.version = 11 : i64} {
  func.func @kernel(%arg0: i32, %arg1: memref<1x8x256xf32, #tpu.memory_space<vmem>>, %arg2: memref<8x72xf32, #tpu.memory_space<vmem>>, %arg3: memref<8x1xf32, #tpu.memory_space<vmem>>, %arg4: memref<8x72xf32, #tpu.memory_space<vmem>>, %arg5: memref<8x1xf32, #tpu.memory_space<vmem>>, %arg6: memref<1x8x192xf32, #tpu.memory_space<vmem>>, %arg7: memref<1x8x176xf32, #tpu.memory_space<vmem>>, %arg8: memref<8x222xf32, #tpu.memory_space<vmem>>, %arg9: memref<72x222xf32, #tpu.memory_space<vmem>>, %arg10: memref<72x188xf32, #tpu.memory_space<vmem>>) attributes {dimension_semantics = [#tpu.dimension_semantics<parallel>], iteration_bounds = array<i64: 2>, scalar_prefetch = 0 : i64, scratch_operands = 3 : i64, tpu.core_type = #tpu.core_type<tc>, window_params = [{transform_indices = @transform_0, window_bounds = array<i64: 1, 8, 256>}, {pipeline_mode = #tpu.pipeline_mode<synchronous>, transform_indices = @transform_1, window_bounds = array<i64: 8, 72>}, {pipeline_mode = #tpu.pipeline_mode<synchronous>, transform_indices = @transform_2, window_bounds = array<i64: 8, 1>}, {pipeline_mode = #tpu.pipeline_mode<synchronous>, transform_indices = @transform_3, window_bounds = array<i64: 8, 72>}, {pipeline_mode = #tpu.pipeline_mode<synchronous>, transform_indices = @transform_4, window_bounds = array<i64: 8, 1>}, {transform_indices = @transform_5, window_bounds = array<i64: 1, 8, 192>}, {transform_indices = @transform_6, window_bounds = array<i64: 1, 8, 176>}]} {
    %c0 = arith.constant 0 : index
    %c0_0 = arith.constant 0 : index
    %0 = vector.load %arg3[%c0, %c0_0] : memref<8x1xf32, #tpu.memory_space<vmem>>, vector<8x1xf32>
    %c0_1 = arith.constant 0 : index
    %c0_2 = arith.constant 0 : index
    %1 = vector.load %arg5[%c0_1, %c0_2] : memref<8x1xf32, #tpu.memory_space<vmem>>, vector<8x1xf32>
    %c0_3 = arith.constant 0 : index
    %c0_4 = arith.constant 0 : index
    %c0_5 = arith.constant 0 : index
    %2 = vector.load %arg1[%c0_3, %c0_4, %c0_5] : memref<1x8x256xf32, #tpu.memory_space<vmem>>, vector<1x8x222xf32>
    %3 = vector.shape_cast %2 : vector<1x8x222xf32> to vector<8x222xf32>
    %c0_6 = arith.constant 0 : index
    %c0_7 = arith.constant 0 : index
    %4 = vector.load %arg9[%c0_6, %c0_7] : memref<72x222xf32, #tpu.memory_space<vmem>>, vector<8x222xf32>
    tpu.vector_store %arg9[%c0_6, %c0_7], %3 {strides = array<i32>} : memref<72x222xf32, #tpu.memory_space<vmem>>, vector<8x222xf32>,
    %c0_8 = arith.constant 0 : index
    %c0_9 = arith.constant 0 : index
    %c1 = arith.constant 1 : index
    %5 = vector.load %arg1[%c0_8, %c0_9, %c1] : memref<1x8x256xf32, #tpu.memory_space<vmem>>, vector<1x8x222xf32>
    %6 = vector.shape_cast %5 : vector<1x8x222xf32> to vector<8x222xf32>
    %c8 = arith.constant 8 : index
    %c0_10 = arith.constant 0 : index
    %7 = vector.load %arg9[%c8, %c0_10] : memref<72x222xf32, #tpu.memory_space<vmem>>, vector<8x222xf32>
    tpu.vector_store %arg9[%c8, %c0_10], %6 {strides = array<i32>} : memref<72x222xf32, #tpu.memory_space<vmem>>, vector<8x222xf32>,
    %c0_11 = arith.constant 0 : index
    %c0_12 = arith.constant 0 : index
    %c2 = arith.constant 2 : index
    %8 = vector.load %arg1[%c0_11, %c0_12, %c2] : memref<1x8x256xf32, #tpu.memory_space<vmem>>, vector<1x8x222xf32>
    %9 = vector.shape_cast %8 : vector<1x8x222xf32> to vector<8x222xf32>
    %c16 = arith.constant 16 : index
    %c0_13 = arith.constant 0 : index
    %10 = vector.load %arg9[%c16, %c0_13] : memref<72x222xf32, #tpu.memory_space<vmem>>, vector<8x222xf32>
    tpu.vector_store %arg9[%c16, %c0_13], %9 {strides = array<i32>} : memref<72x222xf32, #tpu.memory_space<vmem>>, vector<8x222xf32>,
    %c0_14 = arith.constant 0 : index
    %c0_15 = arith.constant 0 : index
    %c16_16 = arith.constant 16 : index
    %11 = vector.load %arg1[%c0_14, %c0_15, %c16_16] : memref<1x8x256xf32, #tpu.memory_space<vmem>>, vector<1x8x222xf32>
    %12 = vector.shape_cast %11 : vector<1x8x222xf32> to vector<8x222xf32>
    %c24 = arith.constant 24 : index
    %c0_17 = arith.constant 0 : index
    %13 = vector.load %arg9[%c24, %c0_17] : memref<72x222xf32, #tpu.memory_space<vmem>>, vector<8x222xf32>
    tpu.vector_store %arg9[%c24, %c0_17], %12 {strides = array<i32>} : memref<72x222xf32, #tpu.memory_space<vmem>>, vector<8x222xf32>,
    %c0_18 = arith.constant 0 : index
    %c0_19 = arith.constant 0 : index
    %c17 = arith.constant 17 : index
    %14 = vector.load %arg1[%c0_18, %c0_19, %c17] : memref<1x8x256xf32, #tpu.memory_space<vmem>>, vector<1x8x222xf32>
    %15 = vector.shape_cast %14 : vector<1x8x222xf32> to vector<8x222xf32>
    %c32 = arith.constant 32 : index
    %c0_20 = arith.constant 0 : index
    %16 = vector.load %arg9[%c32, %c0_20] : memref<72x222xf32, #tpu.memory_space<vmem>>, vector<8x222xf32>
    tpu.vector_store %arg9[%c32, %c0_20], %15 {strides = array<i32>} : memref<72x222xf32, #tpu.memory_space<vmem>>, vector<8x222xf32>,
    %c0_21 = arith.constant 0 : index
    %c0_22 = arith.constant 0 : index
    %c18 = arith.constant 18 : index
    %17 = vector.load %arg1[%c0_21, %c0_22, %c18] : memref<1x8x256xf32, #tpu.memory_space<vmem>>, vector<1x8x222xf32>
    %18 = vector.shape_cast %17 : vector<1x8x222xf32> to vector<8x222xf32>
    %c40 = arith.constant 40 : index
    %c0_23 = arith.constant 0 : index
    %19 = vector.load %arg9[%c40, %c0_23] : memref<72x222xf32, #tpu.memory_space<vmem>>, vector<8x222xf32>
    tpu.vector_store %arg9[%c40, %c0_23], %18 {strides = array<i32>} : memref<72x222xf32, #tpu.memory_space<vmem>>, vector<8x222xf32>,
    %c0_24 = arith.constant 0 : index
    %c0_25 = arith.constant 0 : index
    %c32_26 = arith.constant 32 : index
    %20 = vector.load %arg1[%c0_24, %c0_25, %c32_26] : memref<1x8x256xf32, #tpu.memory_space<vmem>>, vector<1x8x222xf32>
    %21 = vector.shape_cast %20 : vector<1x8x222xf32> to vector<8x222xf32>
    %c48 = arith.constant 48 : index
    %c0_27 = arith.constant 0 : index
    %22 = vector.load %arg9[%c48, %c0_27] : memref<72x222xf32, #tpu.memory_space<vmem>>, vector<8x222xf32>
    tpu.vector_store %arg9[%c48, %c0_27], %21 {strides = array<i32>} : memref<72x222xf32, #tpu.memory_space<vmem>>, vector<8x222xf32>,
    %c0_28 = arith.constant 0 : index
    %c0_29 = arith.constant 0 : index
    %c33 = arith.constant 33 : index
    %23 = vector.load %arg1[%c0_28, %c0_29, %c33] : memref<1x8x256xf32, #tpu.memory_space<vmem>>, vector<1x8x222xf32>
    %24 = vector.shape_cast %23 : vector<1x8x222xf32> to vector<8x222xf32>
    %c56 = arith.constant 56 : index
    %c0_30 = arith.constant 0 : index
    %25 = vector.load %arg9[%c56, %c0_30] : memref<72x222xf32, #tpu.memory_space<vmem>>, vector<8x222xf32>
    tpu.vector_store %arg9[%c56, %c0_30], %24 {strides = array<i32>} : memref<72x222xf32, #tpu.memory_space<vmem>>, vector<8x222xf32>,
    %c0_31 = arith.constant 0 : index
    %c0_32 = arith.constant 0 : index
    %c34 = arith.constant 34 : index
    %26 = vector.load %arg1[%c0_31, %c0_32, %c34] : memref<1x8x256xf32, #tpu.memory_space<vmem>>, vector<1x8x222xf32>
    %27 = vector.shape_cast %26 : vector<1x8x222xf32> to vector<8x222xf32>
    %c64 = arith.constant 64 : index
    %c0_33 = arith.constant 0 : index
    %28 = vector.load %arg9[%c64, %c0_33] : memref<72x222xf32, #tpu.memory_space<vmem>>, vector<8x222xf32>
    tpu.vector_store %arg9[%c64, %c0_33], %27 {strides = array<i32>} : memref<72x222xf32, #tpu.memory_space<vmem>>, vector<8x222xf32>,
    %c0_34 = arith.constant 0 : index
    %c0_35 = arith.constant 0 : index
    %29 = vector.load %arg2[%c0_34, %c0_35] : memref<8x72xf32, #tpu.memory_space<vmem>>, vector<8x72xf32>
    %c0_36 = arith.constant 0 : index
    %c0_37 = arith.constant 0 : index
    %30 = vector.load %arg9[%c0_36, %c0_37] : memref<72x222xf32, #tpu.memory_space<vmem>>, vector<72x222xf32>
    %cst = arith.constant dense<0.000000e+00> : vector<8x222xf32>
    %31 = tpu.matmul %29, %30, %cst {dimension_numbers = #tpu.dot_dimension_numbers<[1], [0], [0], [1], [0, 0, 1, 1], [], []>} : vector<8x72xf32>, vector<72x222xf32>, vector<8x222xf32> -> vector<8x222xf32>
    %32 = vector.broadcast %0 : vector<8x1xf32> to vector<8x222xf32>
    %33 = arith.addf %31, %32 : vector<8x222xf32>
    %cst_38 = arith.constant 0.000000e+00 : f32
    %34 = vector.broadcast %cst_38 : f32 to vector<8x222xf32>
    %35 = arith.maximumf %33, %34 : vector<8x222xf32>
    %c0_39 = arith.constant 0 : index
    %c0_40 = arith.constant 0 : index
    %36 = vector.load %arg8[%c0_39, %c0_40] : memref<8x222xf32, #tpu.memory_space<vmem>>, vector<8x222xf32>
    tpu.vector_store %arg8[%c0_39, %c0_40], %35 {strides = array<i32>} : memref<8x222xf32, #tpu.memory_space<vmem>>, vector<8x222xf32>,
    %c0_41 = arith.constant 0 : index
    %c0_42 = arith.constant 0 : index
    %37 = vector.load %arg8[%c0_41, %c0_42] : memref<8x222xf32, #tpu.memory_space<vmem>>, vector<8x188xf32>
    %c0_43 = arith.constant 0 : index
    %c0_44 = arith.constant 0 : index
    %38 = vector.load %arg10[%c0_43, %c0_44] : memref<72x188xf32, #tpu.memory_space<vmem>>, vector<8x188xf32>
    tpu.vector_store %arg10[%c0_43, %c0_44], %37 {strides = array<i32>} : memref<72x188xf32, #tpu.memory_space<vmem>>, vector<8x188xf32>,
    %c0_45 = arith.constant 0 : index
    %c1_46 = arith.constant 1 : index
    %39 = vector.load %arg8[%c0_45, %c1_46] : memref<8x222xf32, #tpu.memory_space<vmem>>, vector<8x188xf32>
    %c8_47 = arith.constant 8 : index
    %c0_48 = arith.constant 0 : index
    %40 = vector.load %arg10[%c8_47, %c0_48] : memref<72x188xf32, #tpu.memory_space<vmem>>, vector<8x188xf32>
    tpu.vector_store %arg10[%c8_47, %c0_48], %39 {strides = array<i32>} : memref<72x188xf32, #tpu.memory_space<vmem>>, vector<8x188xf32>,
    %c0_49 = arith.constant 0 : index
    %c2_50 = arith.constant 2 : index
    %41 = vector.load %arg8[%c0_49, %c2_50] : memref<8x222xf32, #tpu.memory_space<vmem>>, vector<8x188xf32>
    %c16_51 = arith.constant 16 : index
    %c0_52 = arith.constant 0 : index
    %42 = vector.load %arg10[%c16_51, %c0_52] : memref<72x188xf32, #tpu.memory_space<vmem>>, vector<8x188xf32>
    tpu.vector_store %arg10[%c16_51, %c0_52], %41 {strides = array<i32>} : memref<72x188xf32, #tpu.memory_space<vmem>>, vector<8x188xf32>,
    %c0_53 = arith.constant 0 : index
    %c16_54 = arith.constant 16 : index
    %43 = vector.load %arg8[%c0_53, %c16_54] : memref<8x222xf32, #tpu.memory_space<vmem>>, vector<8x188xf32>
    %c24_55 = arith.constant 24 : index
    %c0_56 = arith.constant 0 : index
    %44 = vector.load %arg10[%c24_55, %c0_56] : memref<72x188xf32, #tpu.memory_space<vmem>>, vector<8x188xf32>
    tpu.vector_store %arg10[%c24_55, %c0_56], %43 {strides = array<i32>} : memref<72x188xf32, #tpu.memory_space<vmem>>, vector<8x188xf32>,
    %c0_57 = arith.constant 0 : index
    %c17_58 = arith.constant 17 : index
    %45 = vector.load %arg8[%c0_57, %c17_58] : memref<8x222xf32, #tpu.memory_space<vmem>>, vector<8x188xf32>
    %c32_59 = arith.constant 32 : index
    %c0_60 = arith.constant 0 : index
    %46 = vector.load %arg10[%c32_59, %c0_60] : memref<72x188xf32, #tpu.memory_space<vmem>>, vector<8x188xf32>
    tpu.vector_store %arg10[%c32_59, %c0_60], %45 {strides = array<i32>} : memref<72x188xf32, #tpu.memory_space<vmem>>, vector<8x188xf32>,
    %c0_61 = arith.constant 0 : index
    %c18_62 = arith.constant 18 : index
    %47 = vector.load %arg8[%c0_61, %c18_62] : memref<8x222xf32, #tpu.memory_space<vmem>>, vector<8x188xf32>
    %c40_63 = arith.constant 40 : index
    %c0_64 = arith.constant 0 : index
    %48 = vector.load %arg10[%c40_63, %c0_64] : memref<72x188xf32, #tpu.memory_space<vmem>>, vector<8x188xf32>
    tpu.vector_store %arg10[%c40_63, %c0_64], %47 {strides = array<i32>} : memref<72x188xf32, #tpu.memory_space<vmem>>, vector<8x188xf32>,
    %c0_65 = arith.constant 0 : index
    %c32_66 = arith.constant 32 : index
    %49 = vector.load %arg8[%c0_65, %c32_66] : memref<8x222xf32, #tpu.memory_space<vmem>>, vector<8x188xf32>
    %c48_67 = arith.constant 48 : index
    %c0_68 = arith.constant 0 : index
    %50 = vector.load %arg10[%c48_67, %c0_68] : memref<72x188xf32, #tpu.memory_space<vmem>>, vector<8x188xf32>
    tpu.vector_store %arg10[%c48_67, %c0_68], %49 {strides = array<i32>} : memref<72x188xf32, #tpu.memory_space<vmem>>, vector<8x188xf32>,
    %c0_69 = arith.constant 0 : index
    %c33_70 = arith.constant 33 : index
    %51 = vector.load %arg8[%c0_69, %c33_70] : memref<8x222xf32, #tpu.memory_space<vmem>>, vector<8x188xf32>
    %c56_71 = arith.constant 56 : index
    %c0_72 = arith.constant 0 : index
    %52 = vector.load %arg10[%c56_71, %c0_72] : memref<72x188xf32, #tpu.memory_space<vmem>>, vector<8x188xf32>
    tpu.vector_store %arg10[%c56_71, %c0_72], %51 {strides = array<i32>} : memref<72x188xf32, #tpu.memory_space<vmem>>, vector<8x188xf32>,
    %c0_73 = arith.constant 0 : index
    %c34_74 = arith.constant 34 : index
    %53 = vector.load %arg8[%c0_73, %c34_74] : memref<8x222xf32, #tpu.memory_space<vmem>>, vector<8x188xf32>
    %c64_75 = arith.constant 64 : index
    %c0_76 = arith.constant 0 : index
    %54 = vector.load %arg10[%c64_75, %c0_76] : memref<72x188xf32, #tpu.memory_space<vmem>>, vector<8x188xf32>
    tpu.vector_store %arg10[%c64_75, %c0_76], %53 {strides = array<i32>} : memref<72x188xf32, #tpu.memory_space<vmem>>, vector<8x188xf32>,
    %c0_77 = arith.constant 0 : index
    %c0_78 = arith.constant 0 : index
    %55 = vector.load %arg4[%c0_77, %c0_78] : memref<8x72xf32, #tpu.memory_space<vmem>>, vector<8x72xf32>
    %c0_79 = arith.constant 0 : index
    %c0_80 = arith.constant 0 : index
    %56 = vector.load %arg10[%c0_79, %c0_80] : memref<72x188xf32, #tpu.memory_space<vmem>>, vector<72x188xf32>
    %cst_81 = arith.constant dense<0.000000e+00> : vector<8x188xf32>
    %57 = tpu.matmul %55, %56, %cst_81 {dimension_numbers = #tpu.dot_dimension_numbers<[1], [0], [0], [1], [0, 0, 1, 1], [], []>} : vector<8x72xf32>, vector<72x188xf32>, vector<8x188xf32> -> vector<8x188xf32>
    %58 = vector.broadcast %1 : vector<8x1xf32> to vector<8x188xf32>
    %59 = arith.addf %57, %58 : vector<8x188xf32>
    %cst_82 = arith.constant 0.000000e+00 : f32
    %60 = vector.broadcast %cst_82 : f32 to vector<8x188xf32>
    %61 = arith.maximumf %59, %60 : vector<8x188xf32>
    %c0_83 = arith.constant 0 : index
    %c0_84 = arith.constant 0 : index
    %c0_85 = arith.constant 0 : index
    %62 = vector.load %arg6[%c0_83, %c0_84, %c0_85] : memref<1x8x192xf32, #tpu.memory_space<vmem>>, vector<1x8x188xf32>
    %63 = vector.shape_cast %62 : vector<1x8x188xf32> to vector<8x188xf32>
    %64 = vector.shape_cast %61 : vector<8x188xf32> to vector<1x8x188xf32>
    tpu.vector_store %arg6[%c0_83, %c0_84, %c0_85], %64 {strides = array<i32>} : memref<1x8x192xf32, #tpu.memory_space<vmem>>, vector<1x8x188xf32>,
    %cst_86 = arith.constant 0.000000e+00 : f32
    %65 = vector.broadcast %cst_86 : f32 to vector<8x4xf32>
    %c0_87 = arith.constant 0 : index
    %c0_88 = arith.constant 0 : index
    %c188 = arith.constant 188 : index
    %66 = vector.load %arg6[%c0_87, %c0_88, %c188] : memref<1x8x192xf32, #tpu.memory_space<vmem>>, vector<1x8x4xf32>
    %67 = vector.shape_cast %66 : vector<1x8x4xf32> to vector<8x4xf32>
    %68 = vector.shape_cast %65 : vector<8x4xf32> to vector<1x8x4xf32>
    tpu.vector_store %arg6[%c0_87, %c0_88, %c188], %68 {strides = array<i32>} : memref<1x8x192xf32, #tpu.memory_space<vmem>>, vector<1x8x4xf32>,
    %c0_89 = arith.constant 0 : index
    %c0_90 = arith.constant 0 : index
    %c0_91 = arith.constant 0 : index
    %69 = vector.load %arg6[%c0_89, %c0_90, %c0_91] : memref<1x8x192xf32, #tpu.memory_space<vmem>>, vector<1x8x171xf32>
    %70 = vector.shape_cast %69 : vector<1x8x171xf32> to vector<8x171xf32>
    %c0_92 = arith.constant 0 : index
    %c0_93 = arith.constant 0 : index
    %c1_94 = arith.constant 1 : index
    %71 = vector.load %arg6[%c0_92, %c0_93, %c1_94] : memref<1x8x192xf32, #tpu.memory_space<vmem>>, vector<1x8x171xf32>
    %72 = vector.shape_cast %71 : vector<1x8x171xf32> to vector<8x171xf32>
    %c0_95 = arith.constant 0 : index
    %c0_96 = arith.constant 0 : index
    %c16_97 = arith.constant 16 : index
    %73 = vector.load %arg6[%c0_95, %c0_96, %c16_97] : memref<1x8x192xf32, #tpu.memory_space<vmem>>, vector<1x8x171xf32>
    %74 = vector.shape_cast %73 : vector<1x8x171xf32> to vector<8x171xf32>
    %c0_98 = arith.constant 0 : index
    %c0_99 = arith.constant 0 : index
    %c17_100 = arith.constant 17 : index
    %75 = vector.load %arg6[%c0_98, %c0_99, %c17_100] : memref<1x8x192xf32, #tpu.memory_space<vmem>>, vector<1x8x171xf32>
    %76 = vector.shape_cast %75 : vector<1x8x171xf32> to vector<8x171xf32>
    %77 = arith.maximumf %70, %72 : vector<8x171xf32>
    %78 = arith.maximumf %74, %76 : vector<8x171xf32>
    %79 = arith.maximumf %77, %78 : vector<8x171xf32>
    %c0_101 = arith.constant 0 : index
    %c0_102 = arith.constant 0 : index
    %c0_103 = arith.constant 0 : index
    %80 = vector.load %arg7[%c0_101, %c0_102, %c0_103] : memref<1x8x176xf32, #tpu.memory_space<vmem>>, vector<1x8x171xf32>
    %81 = vector.shape_cast %80 : vector<1x8x171xf32> to vector<8x171xf32>
    %82 = vector.shape_cast %79 : vector<8x171xf32> to vector<1x8x171xf32>
    tpu.vector_store %arg7[%c0_101, %c0_102, %c0_103], %82 {strides = array<i32>} : memref<1x8x176xf32, #tpu.memory_space<vmem>>, vector<1x8x171xf32>,
    %cst_104 = arith.constant 0.000000e+00 : f32
    %83 = vector.broadcast %cst_104 : f32 to vector<8x5xf32>
    %c0_105 = arith.constant 0 : index
    %c0_106 = arith.constant 0 : index
    %c171 = arith.constant 171 : index
    %84 = vector.load %arg7[%c0_105, %c0_106, %c171] : memref<1x8x176xf32, #tpu.memory_space<vmem>>, vector<1x8x5xf32>
    %85 = vector.shape_cast %84 : vector<1x8x5xf32> to vector<8x5xf32>
    %86 = vector.shape_cast %83 : vector<8x5xf32> to vector<1x8x5xf32>
    tpu.vector_store %arg7[%c0_105, %c0_106, %c171], %86 {strides = array<i32>} : memref<1x8x176xf32, #tpu.memory_space<vmem>>, vector<1x8x5xf32>,
    return
  }
  func.func @transform_0(%arg0: i32) -> (i32, i32, i32) {
    %c0_i32 = arith.constant 0 : i32
    %c0_i32_0 = arith.constant 0 : i32
    %c0_i32_1 = arith.constant 0 : i32
    return %arg0, %c0_i32, %c0_i32_0 : i32, i32, i32
  }
  func.func @transform_1(%arg0: i32) -> (i32, i32) {
    %c0_i32 = arith.constant 0 : i32
    %c0_i32_0 = arith.constant 0 : i32
    %c0_i32_1 = arith.constant 0 : i32
    return %c0_i32, %c0_i32_0 : i32, i32
  }
  func.func @transform_2(%arg0: i32) -> (i32, i32) {
    %c0_i32 = arith.constant 0 : i32
    %c0_i32_0 = arith.constant 0 : i32
    %c0_i32_1 = arith.constant 0 : i32
    return %c0_i32, %c0_i32_0 : i32, i32
  }
  func.func @transform_3(%arg0: i32) -> (i32, i32) {
    %c0_i32 = arith.constant 0 : i32
    %c0_i32_0 = arith.constant 0 : i32
    %c0_i32_1 = arith.constant 0 : i32
    return %c0_i32, %c0_i32_0 : i32, i32
  }
  func.func @transform_4(%arg0: i32) -> (i32, i32) {
    %c0_i32 = arith.constant 0 : i32
    %c0_i32_0 = arith.constant 0 : i32
    %c0_i32_1 = arith.constant 0 : i32
    return %c0_i32, %c0_i32_0 : i32, i32
  }
  func.func @transform_5(%arg0: i32) -> (i32, i32, i32) {
    %c0_i32 = arith.constant 0 : i32
    %c0_i32_0 = arith.constant 0 : i32
    %c0_i32_1 = arith.constant 0 : i32
    return %arg0, %c0_i32, %c0_i32_0 : i32, i32, i32
  }
  func.func @transform_6(%arg0: i32) -> (i32, i32, i32) {
    %c0_i32 = arith.constant 0 : i32
    %c0_i32_0 = arith.constant 0 : i32
    %c0_i32_1 = arith.constant 0 : i32
    return %arg0, %c0_i32, %c0_i32_0 : i32, i32, i32
  }
}

</mosaic_0001>

<bundles_post_ra>
// kernel: contracting_block.1
= control target key start
LH: loop header
LB: loop body
LE: loop exit
PB: predicated region body
PF: predicated region fallthrough
CT: control target
= control target key end

     0   :  { %s906_s21 = smov 0   ;;  %s1045_s0 = inlined_call_operand.vmem [shape: f32[2,8,256], index: 0, kind: input, shape index: {}]   ;;  %s1046_s1 = inlined_call_operand.vmem [shape: f32[8,72], index: 1, kind: input, shape index: {}]   ;;  %s1047_s2 = inlined_call_operand.vmem [shape: f32[8,1], index: 2, kind: input, shape index: {}]   ;;  %s1048_s3 = inlined_call_operand.vmem [shape: f32[8,72], index: 3, kind: input, shape index: {}]   ;;  %s1049_s4 = inlined_call_operand.vmem [shape: f32[8,1], index: 4, kind: input, shape index: {}]   ;;  %s1050_s5 = inlined_call_operand.vmem [shape: f32[2,8,192], index: 5, kind: output, shape index: {0}]   ;;  %s1051_s6 = inlined_call_operand.vmem [shape: f32[2,8,176], index: 6, kind: output, shape index: {1}]  }
   0x1 LB: > { %s816_s22 = sadd.s32 4294967295, %s859_s21   ;;  %p820_p0 = scmp.ge.s32.totalorder %s859_s21, 1  ;;  %s859_s21 = sphi %s906_s21, %s17_s21  }
   0x2   : > { %p215_p1 = scmp.lt.s32.totalorder %s859_s21, 3 }
   0x4   : > { %p216_p2 = pnand %p820_p0, %p215_p1 }
   0x5   : > { %p250_p3 = scmp.lt.s32.totalorder (!%p216_p2), %s816_s22, 1  ;;  %s861_s27 = smov (!%p216_p2), 94  }
   0x6   : > { %219 = sbr.rel (%p216_p2) target bundleno = 977 (0x3d1), region = 40  ;;  %s862_s28 = smov (!%p216_p2), 95  }
   0x7   : > { %s863_s29 = smov (!%p216_p2), 96   ;;  %s864_s30 = smov (!%p216_p2), 110  }
   0x8   : > { %s865_s7 = smov (!%p216_p2), 111   ;;  %s866_s8 = smov (!%p216_p2), 112  }
   0x9   : > { %s867_s9 = smov (!%p216_p2), 126   ;;  %s869_s10 = smov (!%p216_p2), 127  }
   0xb   : > { %s1053_s22 = smov (!%p250_p3, %s816_s22), 1  ;;  %vm270_vm0 = vcmask 769024   ;;  %v868_v2 = vmov 0.0   ;;  %v870_v3 = vmov 0   ;;  %v265_v4 = vld [vmem:[%s1047_s2] sm:$0xff]  ;;  %vm364_vm1 = vcmask 777216  }
   0xc   : > { %s914_s23 = sshll.u32 %s1053_s22, 4  ;;  %475 = vmatprep.mubr.f32.mxu0 %v868_v2  ;;  %686 = vmatprep.mubr.f32.mxu1 %v868_v2  ;;  %vm350_vm2 = vcmask 785408   ;;  %vm336_vm3 = vcmask 900096   ;;  %vm322_vm4 = vcmask 908288   ;;  %vm308_vm5 = vcmask 916480   ;;  %v383_v38 = vld [vmem:[%s1046_s1] sm:$0xff] }
   0xd   : > { %s254_s26 = scalar_lea.vmem %s1045_s0, %s914_s23  ;;  %852 = vset.pattern.permute.xlu0 %v870_v3  ;;  %vm294_vm6 = vcmask 1031168   ;;  %vm280_vm7 = vcmask 1039360   ;;  %vm407_vm8 = vcmask 588800   ;;  %vm489_vm9 = vcmask 490496   ;;  %v266_v47 = vld [vmem:[%s1049_s4] sm:$0xff]  ;;  %s259_s22 = scalar_lea.vmem %s1050_s5, %s914_s23 }
   0xe   : > { %v920_v0 = vld [vmem:[%s254_s26] sm:$0xff]  ;;  %v371_v1 = vld [vmem:[%s254_s26 + $0x8] sm:$0xff]  ;;  %vm697_vm10 = vcmask 523744   ;;  %s264_s26 = scalar_lea.vmem %s1051_s6, %s914_s23  ;;  %vm724_vm11 = vcmask 351232   ;;  %vm726_vm12 = vcmask 392536  }
   0xf   : > { %374 = vrot.lane.b32.xlu0 %v920_v0, %s861_s27  ;;  %360 = vrot.lane.b32.xlu1 %v920_v0, %s862_s28  ;;  %271 = vst.msk [vmem:[#allocation3 + $0x8] sm:$0xff] %vm270_vm0, %v371_v1 }
  0x13   : > { %376 = vrot.lane.b32.xlu0 %v371_v1, %s861_s27  ;;  %362 = vrot.lane.b32.xlu1 %v371_v1, %s862_s28 }
  0x16   : > { %v385_v37 = vld [vmem:[#allocation3 + $0x8] sm:$0xff] }
  0x17   : > { %348 = vrot.lane.b32.xlu1 %v371_v1, %s863_s29  ;;  %346 = vrot.lane.b32.xlu0 %v920_v0, %s863_s29 }
  0x1b   : > { %334 = vrot.lane.b32.xlu1 %v371_v1, %s864_s30  ;;  %332 = vrot.lane.b32.xlu0 %v920_v0, %s864_s30 }
  0x1f   : > { %320 = vrot.lane.b32.xlu1 %v371_v1, %s865_s7  ;;  %318 = vrot.lane.b32.xlu0 %v920_v0, %s865_s7 }
  0x23   : > { %306 = vrot.lane.b32.xlu1 %v371_v1, %s866_s8  ;;  %304 = vrot.lane.b32.xlu0 %v920_v0, %s866_s8 }
  0x27   : > { %292 = vrot.lane.b32.xlu1 %v371_v1, %s867_s9  ;;  %290 = vrot.lane.b32.xlu0 %v920_v0, %s867_s9 }
  0x2b   : > { %278 = vrot.lane.b32.xlu1 %v371_v1, %s869_s10  ;;  %276 = vrot.lane.b32.xlu0 %v920_v0, %s869_s10 }
  0x2f   : > { %404 = vperm.xlu0 %852, %v265_v4  }
  0x81   : > { %v375_v5 = vpop.permute.xlu0 %374  ;;  %v361_v6 = vpop.permute.xlu1 %360 }
  0x85   : > { %v377_v7 = vpop.permute.xlu0 %376  ;;  %v363_v8 = vpop.permute.xlu1 %362 }
  0x86   : > { %v378_v9 = vsel %vm270_vm0, %v375_v5, %v377_v7  ;;  %382 = vst.msk [vmem:[#allocation3 + $0x88] sm:$0xff] %vm270_vm0, %v377_v7  ;;  %v365_v10 = vsel %vm364_vm1, %v361_v6, %v363_v8  ;;  %369 = vst.msk [vmem:[#allocation3 + $0x78] sm:$0xff] %vm270_vm0, %v363_v8 }
  0x89   : > { %v349_v11 = vpop.permute.xlu1 %348  ;;  %v347_v12 = vpop.permute.xlu0 %346 }
  0x8a   : > { %355 = vst.msk [vmem:[#allocation3 + $0x68] sm:$0xff] %vm270_vm0, %v349_v11  ;;  %v351_v13 = vsel %vm350_vm2, %v347_v12, %v349_v11 }
  0x8d   : > { %v335_v14 = vpop.permute.xlu1 %334  ;;  %v333_v15 = vpop.permute.xlu0 %332  ;;  %v401_v16 = vld [vmem:[#allocation3 + $0x88] sm:$0xff]  ;;  %v399_v18 = vld [vmem:[#allocation3 + $0x78] sm:$0xff] }
  0x8e   : > { %341 = vst.msk [vmem:[#allocation3 + $0x58] sm:$0xff] %vm270_vm0, %v335_v14  ;;  %v337_v17 = vsel %vm336_vm3, %v333_v15, %v335_v14  ;;  %425 = vmatprep.subr.mxu0 %v401_v16 }
  0x8f   : > { %426 = vmatpush1.msra.mxu0 %v378_v9 }
  0x90   : > { %427 = vmatprep.subr.mxu0 %v399_v18  ;;  %v595_v18 = vld [vmem:[%s1048_s3] sm:$0xff] }
  0x91   : > { %428 = vmatpush1.msra.mxu0 %v365_v10  ;;  %v321_v19 = vpop.permute.xlu1 %320  ;;  %v319_v20 = vpop.permute.xlu0 %318  ;;  %v397_v21 = vld [vmem:[#allocation3 + $0x68] sm:$0xff] }
  0x92   : > { %327 = vst.msk [vmem:[#allocation3 + $0x48] sm:$0xff] %vm270_vm0, %v321_v19  ;;  %v323_v22 = vsel %vm322_vm4, %v319_v20, %v321_v19  ;;  %429 = vmatprep.subr.mxu0 %v397_v21 }
  0x93   : > { %430 = vmatpush1.msra.mxu0 %v351_v13 }
  0x95   : > { %v307_v23 = vpop.permute.xlu1 %306  ;;  %v305_v24 = vpop.permute.xlu0 %304  ;;  %v395_v25 = vld [vmem:[#allocation3 + $0x58] sm:$0xff] }
  0x96   : > { %313 = vst.msk [vmem:[#allocation3 + $0x38] sm:$0xff] %vm270_vm0, %v307_v23  ;;  %v309_v26 = vsel %vm308_vm5, %v305_v24, %v307_v23  ;;  %431 = vmatprep.subr.mxu0 %v395_v25 }
  0x97   : > { %432 = vmatpush1.msra.mxu0 %v337_v17 }
  0x99   : > { %v293_v27 = vpop.permute.xlu1 %292  ;;  %v291_v28 = vpop.permute.xlu0 %290  ;;  %v393_v29 = vld [vmem:[#allocation3 + $0x48] sm:$0xff] }
  0x9a   : > { %299 = vst.msk [vmem:[#allocation3 + $0x28] sm:$0xff] %vm270_vm0, %v293_v27  ;;  %v295_v30 = vsel %vm294_vm6, %v291_v28, %v293_v27  ;;  %433 = vmatprep.subr.mxu0 %v393_v29 }
  0x9b   : > { %434 = vmatpush1.msra.mxu0 %v323_v22 }
  0x9d   : > { %v279_v31 = vpop.permute.xlu1 %278  ;;  %v277_v32 = vpop.permute.xlu0 %276  ;;  %v391_v33 = vld [vmem:[#allocation3 + $0x38] sm:$0xff] }
  0x9e   : > { %285 = vst.msk [vmem:[#allocation3 + $0x18] sm:$0xff] %vm270_vm0, %v279_v31  ;;  %v281_v34 = vsel %vm280_vm7, %v277_v32, %v279_v31  ;;  %435 = vmatprep.subr.mxu0 %v391_v33 }
  0x9f   : > { %436 = vmatpush1.msra.mxu0 %v309_v26 }
  0xa1   : > { %v389_v35 = vld [vmem:[#allocation3 + $0x28] sm:$0xff] }
  0xa2   : > { %437 = vmatprep.subr.mxu0 %v389_v35 }
  0xa3   : > { %438 = vmatpush1.msra.mxu0 %v295_v30 }
  0xa5   : > { %v387_v36 = vld [vmem:[#allocation3 + $0x18] sm:$0xff] }
  0xa6   : > { %439 = vmatprep.subr.mxu0 %v387_v36 }
  0xa7   : > { %440 = vmatpush1.msra.mxu0 %v281_v34 }
  0xa8   : > { %441 = vmatprep.subr.mxu0 %v385_v37 }
  0xa9   : > { %442 = vmatpush1.msra.mxu0 %v920_v0 }
  0xaa   : > { %827 = vmatmul.mubr.msk.f32.vlgmr.msra.gmra.mxu0 %vm407_vm8, %v383_v38  ;;  %v405_v39 = vpop.permute.xlu0 %404 }
 0x16a   : > { %v477_v40 = vpop.f32.mrf.mxu0 }
 0x16b   : > { %v478_v41 = vadd.f32 %v477_v40, %v405_v39 }
 0x16c   : > { %v479_v42 = vpop.f32.mrf.mxu0 }
 0x16d   : > { %v973_v43 = vmax.f32 %v478_v41, 0.0  ;;  %v480_v44 = vadd.f32 %v479_v42, %v405_v39 }
 0x16f   : > { %v483_v45 = vmax.f32 %v480_v44, 0.0  ;;  %586 = vrot.lane.b32.xlu1 %v973_v43, %s861_s27  ;;  %573 = vrot.lane.b32.xlu0 %v973_v43, %s862_s28 }
 0x171   : > { %485 = vst.msk [vmem:[#allocation2 + $0x8] sm:$0xff] %vm270_vm0, %v483_v45 }
 0x173   : > { %560 = vrot.lane.b32.xlu0 %v973_v43, %s863_s29 }
 0x177   : > { %547 = vrot.lane.b32.xlu0 %v973_v43, %s864_s30 }
 0x178   : > { %v583_v46 = vld [vmem:[#allocation2 + $0x8] sm:$0xff] }
 0x179   : > { %588 = vrot.lane.b32.xlu1 %v583_v46, %s861_s27  ;;  %490 = vst.msk [vmem:[#allocation4 + $0x8] sm:$0xff] %vm489_vm9, %v583_v46 }
 0x17b   : > { %534 = vrot.lane.b32.xlu0 %v973_v43, %s865_s7 }
 0x17d   : > { %575 = vrot.lane.b32.xlu1 %v583_v46, %s862_s28 }
 0x17f   : > { %521 = vrot.lane.b32.xlu0 %v973_v43, %s866_s8 }
 0x180   : > { %v597_v17 = vld [vmem:[#allocation4 + $0x8] sm:$0xff] }
 0x181   : > { %562 = vrot.lane.b32.xlu1 %v583_v46, %s863_s29 }
 0x183   : > { %508 = vrot.lane.b32.xlu0 %v973_v43, %s867_s9 }
 0x185   : > { %549 = vrot.lane.b32.xlu1 %v583_v46, %s864_s30 }
 0x187   : > { %495 = vrot.lane.b32.xlu0 %v973_v43, %s869_s10 }
 0x189   : > { %536 = vrot.lane.b32.xlu1 %v583_v46, %s865_s7 }
 0x18b   : > { %616 = vperm.xlu0 %852, %v266_v47  }
 0x18d   : > { %523 = vrot.lane.b32.xlu1 %v583_v46, %s866_s8 }
 0x191   : > { %510 = vrot.lane.b32.xlu1 %v583_v46, %s867_s9 }
 0x195   : > { %497 = vrot.lane.b32.xlu1 %v583_v46, %s869_s10 }
 0x1e1   : > { %v574_v48 = vpop.permute.xlu0 %573  ;;  %v587_v49 = vpop.permute.xlu1 %586 }
 0x1e5   : > { %v561_v50 = vpop.permute.xlu0 %560 }
 0x1e9   : > { %v548_v54 = vpop.permute.xlu0 %547 }
 0x1eb   : > { %v589_v51 = vpop.permute.xlu1 %588 }
 0x1ec   : > { %v590_v52 = vsel %vm270_vm0, %v587_v49, %v589_v51  ;;  %594 = vst.msk [vmem:[#allocation4 + $0x88] sm:$0xff] %vm489_vm9, %v589_v51 }
 0x1ed   : > { %v535_v59 = vpop.permute.xlu0 %534 }
 0x1ef   : > { %v576_v53 = vpop.permute.xlu1 %575 }
 0x1f0   : > { %v577_v55 = vsel %vm364_vm1, %v574_v48, %v576_v53  ;;  %581 = vst.msk [vmem:[#allocation4 + $0x78] sm:$0xff] %vm489_vm9, %v576_v53 }
 0x1f1   : > { %v522_v63 = vpop.permute.xlu0 %521 }
 0x1f3   : > { %v563_v56 = vpop.permute.xlu1 %562  ;;  %v613_v57 = vld [vmem:[#allocation4 + $0x88] sm:$0xff] }
 0x1f4   : > { %v564_v58 = vsel %vm350_vm2, %v561_v50, %v563_v56  ;;  %568 = vst.msk [vmem:[#allocation4 + $0x68] sm:$0xff] %vm489_vm9, %v563_v56  ;;  %636 = vmatprep.subr.mxu1 %v613_v57 }
 0x1f5   : > { %637 = vmatpush1.msra.mxu1 %v590_v52  ;;  %v509_v7 = vpop.permute.xlu0 %508 }
 0x1f7   : > { %v550_v60 = vpop.permute.xlu1 %549  ;;  %v611_v61 = vld [vmem:[#allocation4 + $0x78] sm:$0xff] }
 0x1f8   : > { %v551_v62 = vsel %vm336_vm3, %v548_v54, %v550_v60  ;;  %555 = vst.msk [vmem:[#allocation4 + $0x58] sm:$0xff] %vm489_vm9, %v550_v60  ;;  %638 = vmatprep.subr.mxu1 %v611_v61 }
 0x1f9   : > { %639 = vmatpush1.msra.mxu1 %v577_v55  ;;  %v496_v11 = vpop.permute.xlu0 %495 }
 0x1fb   : > { %v537_v0 = vpop.permute.xlu1 %536  ;;  %v609_v1 = vld [vmem:[#allocation4 + $0x68] sm:$0xff] }
 0x1fc   : > { %v538_v3 = vsel %vm322_vm4, %v535_v59, %v537_v0  ;;  %542 = vst.msk [vmem:[#allocation4 + $0x48] sm:$0xff] %vm489_vm9, %v537_v0  ;;  %640 = vmatprep.subr.mxu1 %v609_v1 }
 0x1fd   : > { %641 = vmatpush1.msra.mxu1 %v564_v58 }
 0x1ff   : > { %v524_v4 = vpop.permute.xlu1 %523  ;;  %v607_v5 = vld [vmem:[#allocation4 + $0x58] sm:$0xff] }
 0x200   : > { %v525_v6 = vsel %vm308_vm5, %v522_v63, %v524_v4  ;;  %529 = vst.msk [vmem:[#allocation4 + $0x38] sm:$0xff] %vm489_vm9, %v524_v4  ;;  %642 = vmatprep.subr.mxu1 %v607_v5 }
 0x201   : > { %643 = vmatpush1.msra.mxu1 %v551_v62 }
 0x203   : > { %v511_v8 = vpop.permute.xlu1 %510  ;;  %v605_v9 = vld [vmem:[#allocation4 + $0x48] sm:$0xff] }
 0x204   : > { %v512_v10 = vsel %vm294_vm6, %v509_v7, %v511_v8  ;;  %516 = vst.msk [vmem:[#allocation4 + $0x28] sm:$0xff] %vm489_vm9, %v511_v8  ;;  %644 = vmatprep.subr.mxu1 %v605_v9 }
 0x205   : > { %645 = vmatpush1.msra.mxu1 %v538_v3 }
 0x206   : > { %v617_v19 = vpop.permute.xlu0 %616 }
 0x207   : > { %v498_v12 = vpop.permute.xlu1 %497  ;;  %v603_v13 = vld [vmem:[#allocation4 + $0x38] sm:$0xff] }
 0x208   : > { %v499_v14 = vsel %vm280_vm7, %v496_v11, %v498_v12  ;;  %503 = vst.msk [vmem:[#allocation4 + $0x18] sm:$0xff] %vm489_vm9, %v498_v12  ;;  %646 = vmatprep.subr.mxu1 %v603_v13 }
 0x209   : > { %647 = vmatpush1.msra.mxu1 %v525_v6 }
 0x20b   : > { %v601_v15 = vld [vmem:[#allocation4 + $0x28] sm:$0xff] }
 0x20c   : > { %648 = vmatprep.subr.mxu1 %v601_v15 }
 0x20d   : > { %649 = vmatpush1.msra.mxu1 %v512_v10 }
 0x20f   : > { %v599_v16 = vld [vmem:[#allocation4 + $0x18] sm:$0xff] }
 0x210   : > { %650 = vmatprep.subr.mxu1 %v599_v16 }
 0x211   : > { %651 = vmatpush1.msra.mxu1 %v499_v14 }
 0x212   : > { %652 = vmatprep.subr.mxu1 %v597_v17 }
 0x213   : > { %653 = vmatpush1.msra.mxu1 %v973_v43 }
 0x214   : > { %828 = vmatmul.mubr.msk.f32.vlgmr.msra.gmra.mxu1 %vm407_vm8, %v595_v18 }
 0x2d4   : > { %v688_v20 = vpop.f32.mrf.mxu1 }
 0x2d5   : > { %v689_v21 = vadd.f32 %v688_v20, %v617_v19 }
 0x2d6   : > { %v690_v22 = vpop.f32.mrf.mxu1 }
 0x2d7   : > { %v693_v23 = vmax.f32 %v689_v21, 0.0  ;;  %v691_v24 = vadd.f32 %v690_v22, %v617_v19 }
 0x2d9   : > { %695 = vst [vmem:[%s259_s22] sm:$0xff] %v693_v23  ;;  %v694_v25 = vmax.f32 %v691_v24, 0.0  ;;  %703 = vrot.lane.b32.xlu1 %v693_v23, %s869_s10 }
 0x2db   : > { %696 = vst.msk [vmem:[%s259_s22 + $0x8] sm:$0xff] %vm489_vm9, %v694_v25 }
 0x2dc   : > { %698 = vst.msk [vmem:[%s259_s22 + $0x8] sm:$0xff] %vm697_vm10, %v868_v2 }
 0x2e3   : > { %v700_v26 = vld [vmem:[%s259_s22 + $0x8] sm:$0xff] }
 0x2e4   : > { %705 = vrot.lane.b32.xlu0 %v700_v26, %s869_s10 }
 0x34b   : > { %v704_v27 = vpop.permute.xlu1 %703 }
 0x356   : > { %v706_v28 = vpop.permute.xlu0 %705 }
 0x357   : > { %v707_v29 = vsel %vm280_vm7, %v704_v27, %v706_v28  ;;  %v711_v30 = vmax.f32 %v700_v26, %v706_v28 }
 0x358   : > { %v710_v31 = vmax.f32 %v693_v23, %v707_v29 }
 0x359   : > { %716 = vrot.lane.b32.xlu0 %v711_v30, %s866_s8 }
 0x35a   : > { %714 = vrot.lane.b32.xlu1 %v710_v31, %s866_s8 }
 0x3cb   : > { %v717_v32 = vpop.permute.xlu0 %716 }
 0x3cc   : > { %v722_v33 = vmax.f32 %v711_v30, %v717_v32  ;;  %v715_v34 = vpop.permute.xlu1 %714 }
 0x3cd   : > { %v718_v35 = vsel %vm308_vm5, %v715_v34, %v717_v32 }
 0x3ce   : > { %725 = vst.msk [vmem:[%s264_s26 + $0x8] sm:$0xff] %vm724_vm11, %v722_v33  ;;  %v721_v36 = vmax.f32 %v710_v31, %v718_v35 }
 0x3cf   : > { %727 = vst.msk [vmem:[%s264_s26 + $0x8] sm:$0xff] %vm726_vm12, %v868_v2 }
 0x3d0   : > { %723 = vst [vmem:[%s264_s26] sm:$0xff] %v721_v36 }
 0x3d1 PF: > { %s17_s21 = sadd.s32 1, %s859_s21  }
 0x3d2   : > { %p14_p4 = scmp.ge.s32.totalorder %s17_s21, 4  }
 0x3d4   :  { %16 = sbr.rel (!%p14_p4) target bundleno = 1 (0x1), region = 82 }

</bundles_post_ra>
